<compile_context>
chip_gen: v7x
topology: tpu7x:2x2x1
jax: 0.10.0
libtpu: 0.0.40
codegen_flags: <defaults>
</compile_context>

<pallas_src>
import functools

import jax
import jax.numpy as jnp
from jax.experimental import pallas as pl
from jax.experimental.pallas import tpu as pltpu


def _round_up(x, m):
    return ((x + m - 1) // m) * m


def _cdiv(a, b):
    return (a + b - 1) // b


def _choose_tile(dim, target, align):
    """Largest multiple of `align` that divides `dim` and is <= target.

    Falls back to min(target, round_up(dim, align)) (cdiv / masked-tail path)
    when no such divisor exists.
    """
    hi = (min(target, dim) // align) * align
    for cand in range(hi, 0, -align):
        if dim % cand == 0:
            return cand
    return min(target, _round_up(max(dim, 1), align))


# ----------------------------- Pallas kernel ------------------------------ #
def convblock_kernel(qp_ref, p_ref, w_ref, scale_ref, bias_ref, o_ref):
    # qp_ref    : (3,) SMEM f32 [alpha, step, inv_step]  (PACT 2-bit params)
    # p_ref     : (tm, K)  bf16 im2col patch panel
    # w_ref     : (K, tn)  bf16 LSQ-quantized weight panel
    # scale_ref : (1, tn)  f32 BN scale  (gamma / sqrt(var + eps))
    # bias_ref  : (1, tn)  f32 BN bias   (beta - mean * scale)
    # o_ref     : (tm, tn) output (f32 by default)
    acc = jnp.dot(p_ref[...], w_ref[...], preferred_element_type=jnp.float32)
    y = acc * scale_ref[...] + bias_ref[...]

    alpha = qp_ref[0]
    step = qp_ref[1]
    inv_step = qp_ref[2]
    # PACT 2-bit unsigned activation fake-quant: clip to [0, alpha], 3 steps,
    # multiply by precomputed 1/step (no per-element divide).
    y = jnp.clip(y, 0.0, alpha)
    y = jnp.round(y * inv_step) * step
    o_ref[...] = y.astype(o_ref.dtype)


def _fused_matmul_bn_pact(patches, w_bf16, bn_scale, bn_bias, alpha, *,
                          tm_target=512, tn_target=256,
                          out_dtype=jnp.float32,
                          vmem_block_budget=24 * 1024 * 1024):
    """patches: (M, K) bf16, w_bf16: (K, Cout) bf16 -> (M, Cout) out_dtype."""
    M, K = patches.shape
    K2, Cout = w_bf16.shape
    assert K == K2
    out_itemsize = jnp.dtype(out_dtype).itemsize

    # ---- tile selection (no operand padding: full-K, full/divisor Cout) ----
    # tn: 256-aligned for the 256-wide MXU (v6e/v7x) when Cout allows,
    #     otherwise the full Cout (full-dim block, no padding required).
    tn = tn_target if (Cout > tn_target and Cout % tn_target == 0) else Cout
    tm = _choose_tile(M, tm_target, 8)

    # Keep >= 2 parallel grid steps (v7x has 2 TensorCores sharding the
    # "parallel" axes); shrink tm if the grid would collapse to one step.
    while _cdiv(M, tm) * _cdiv(Cout, tn) < 2 and tm > 8:
        tm = _choose_tile(M, max(8, tm // 2), 8)

    # Clamp to a conservative VMEM budget (double-buffered panels), so the
    # same config is safe on v7x's 64 MiB physical / 32 MiB scoped VMEM.
    def _block_bytes(tm_, tn_):
        return 2 * (tm_ * K * 2            # bf16 patch panel
                    + K * tn_ * 2          # bf16 weight panel
                    + tm_ * tn_ * out_itemsize
                    + 2 * tn_ * 4)         # BN scale + bias

    while _block_bytes(tm, tn) > vmem_block_budget and tm > 64:
        tm = _choose_tile(M, max(8, tm // 2), 8)

    grid = (_cdiv(M, tm), _cdiv(Cout, tn))

    # PACT scalar params (alpha clamped away from zero to avoid inf/NaN).
    alpha = jnp.maximum(jnp.asarray(alpha, jnp.float32), 1e-4)
    n_levels = jnp.float32(3.0)            # 2**act_bit_width - 1, bit_width=2
    step = alpha / n_levels
    inv_step = n_levels / alpha
    qparams = jnp.stack([alpha, step, inv_step]).astype(jnp.float32)

    scale_2d = bn_scale.reshape(1, Cout).astype(jnp.float32)
    bias_2d = bn_bias.reshape(1, Cout).astype(jnp.float32)

    # Cost estimate from TRUE dims and actual per-pass traffic:
    # patches are streamed once (their block index ignores j), weights are
    # re-streamed once per M block, plus BN vectors and output writeback.
    cost = pl.CostEstimate(
        flops=2 * M * K * Cout,
        transcendentals=0,
        bytes_accessed=(M * K * 2
                        + grid[0] * K * Cout * 2
                        + 2 * Cout * 4
                        + M * Cout * out_itemsize),
    )

    vmem_limit = int(min(max(_block_bytes(tm, tn) + (4 << 20), 32 << 20),
                         48 << 20))

    out = pl.pallas_call(
        convblock_kernel,
        out_shape=jax.ShapeDtypeStruct((M, Cout), out_dtype),
        grid_spec=pltpu.PrefetchScalarGridSpec(
            num_scalar_prefetch=0,
            grid=grid,
            in_specs=[
                pl.BlockSpec(memory_space=pltpu.MemorySpace.SMEM),   # qparams
                pl.BlockSpec((tm, K), lambda i, j: (i, 0)),          # patches
                pl.BlockSpec((K, tn), lambda i, j: (0, j)),          # weights
                pl.BlockSpec((1, tn), lambda i, j: (0, j)),          # bn scale
                pl.BlockSpec((1, tn), lambda i, j: (0, j)),          # bn bias
            ],
            out_specs=pl.BlockSpec((tm, tn), lambda i, j: (i, j)),
        ),
        compiler_params=pltpu.CompilerParams(
            dimension_semantics=("parallel", "parallel"),
            vmem_limit_bytes=vmem_limit),
        cost_estimate=cost,
    )(qparams, patches, w_bf16, scale_2d, bias_2d)
    return out


# ------------------------------ glue (JAX) -------------------------------- #
def _im2col_nhwc(x, kh, kw, stride, padding):
    """x: (N, H, W, C) -> (N*OH*OW, kh*kw*C), plus (OH, OW).  Dtype preserved."""
    N, H, W, C = x.shape
    xp = jnp.pad(x, ((0, 0), (padding, padding), (padding, padding), (0, 0)))
    OH = (H + 2 * padding - kh) // stride + 1
    OW = (W + 2 * padding - kw) // stride + 1
    cols = []
    for i in range(kh):
        for j in range(kw):
            cols.append(xp[:, i:i + stride * OH:stride, j:j + stride * OW:stride, :])
    p = jnp.stack(cols, axis=3)                 # (N, OH, OW, kh*kw, C)
    return p.reshape(N * OH * OW, kh * kw * C), OH, OW


def _lsq_weight_quant_2bit(w):
    """2-bit signed LSQ-style fake quant with a deterministic (fixed) scale."""
    qmin, qmax = -2.0, 1.0
    scale = 2.0 * jnp.mean(jnp.abs(w)) + 1e-8
    return jnp.clip(jnp.round(w / scale), qmin, qmax) * scale


def conv_block_forward_nhwc(x_nhwc, params, *, stride=1, padding=1,
                            out_dtype=jnp.float32):
    """ConvBlock forward, NHWC in / NHWC out (native layout, no transposes).

    Chain this version between ConvBlocks to keep activations NHWC end-to-end.
    Set out_dtype=jnp.bfloat16 to halve output HBM writeback (PACT output has
    only 4 levels, so bf16 is plenty).
    """
    w = params["conv_weight"]                   # (Cout, Cin, KH, KW)
    Cout, Cin, KH, KW = w.shape

    # Weight fake-quant (LSQ 2-bit) — parameter prep, plain JAX / f32.
    wq = _lsq_weight_quant_2bit(w)
    # Reorder to (KH*KW*Cin, Cout) to match the im2col patch layout; only the
    # quantized weights are cast to bf16 (BN scale stays f32 in the epilogue).
    w_mat = jnp.transpose(wq, (2, 3, 1, 0)).reshape(KH * KW * Cin, Cout)
    w_bf16 = w_mat.astype(jnp.bfloat16)

    # BatchNorm (inference) as per-channel f32 scale/bias applied in-kernel.
    eps = 1e-5
    bn_scale = params["bn_gamma"] / jnp.sqrt(params["bn_var"] + eps)
    bn_bias = params["bn_beta"] - params["bn_mean"] * bn_scale

    # im2col in bf16 (halves the patch-matrix HBM footprint; MXU-native).
    x = x_nhwc.astype(jnp.bfloat16)
    patches, OH, OW = _im2col_nhwc(x, KH, KW, stride, padding)

    out_flat = _fused_matmul_bn_pact(
        patches, w_bf16, bn_scale, bn_bias, params["pact_alpha"],
        out_dtype=out_dtype)

    N = x_nhwc.shape[0]
    return out_flat.reshape(N, OH, OW, Cout)


def conv_block_forward(x_nchw, params, *, stride=1, padding=1):
    """NCHW-compatible wrapper (transposes only at network entry/exit)."""
    x_nhwc = jnp.transpose(x_nchw, (0, 2, 3, 1))
    out = conv_block_forward_nhwc(x_nhwc, params, stride=stride, padding=padding)
    return jnp.transpose(out, (0, 3, 1, 2))


def _reference_forward(x_nchw, params, *, stride=1, padding=1):
    """Plain-JAX f32 reference for a sanity check."""
    wq = _lsq_weight_quant_2bit(params["conv_weight"])
    y = jax.lax.conv_general_dilated(
        x_nchw, wq, window_strides=(stride, stride),
        padding=[(padding, padding), (padding, padding)],
        dimension_numbers=("NCHW", "OIHW", "NCHW"))
    eps = 1e-5
    scale = params["bn_gamma"] / jnp.sqrt(params["bn_var"] + eps)
    bias = params["bn_beta"] - params["bn_mean"] * scale
    y = y * scale[None, :, None, None] + bias[None, :, None, None]
    alpha = jnp.maximum(jnp.asarray(params["pact_alpha"], jnp.float32), 1e-4)
    step = alpha / 3.0
    y = jnp.clip(y, 0.0, alpha)
    return jnp.round(y / step) * step


# --------------------------------- main ------------------------------------ #
if __name__ == "__main__":
    key = jax.random.PRNGKey(0)
    k_x, k_w, k_g, k_b, k_m, k_v = jax.random.split(key, 6)

    # Small shapes consistent with the module: ConvBlock(4 -> 8, 3x3, pad=1).
    N, Cin, H, W = 2, 4, 16, 16
    Cout, KH, KW = 8, 3, 3

    x = jax.random.normal(k_x, (N, Cin, H, W), jnp.float32)

    params = {
        "conv_weight": 0.1 * jax.random.normal(k_w, (Cout, Cin, KH, KW), jnp.float32),
        "bn_gamma": 1.0 + 0.05 * jax.random.normal(k_g, (Cout,), jnp.float32),
        "bn_beta": 0.05 * jax.random.normal(k_b, (Cout,), jnp.float32),
        "bn_mean": 0.05 * jax.random.normal(k_m, (Cout,), jnp.float32),
        "bn_var": jnp.abs(jax.random.normal(k_v, (Cout,), jnp.float32)) + 0.5,
        "pact_alpha": jnp.float32(6.0),         # PACT learned clip value (fixed here)
    }

    fwd = jax.jit(functools.partial(conv_block_forward, stride=1, padding=1))
    out = fwd(x, params)
    jax.block_until_ready(out)
    assert out.shape == (N, Cout, H, W), out.shape

    # Loose numeric sanity check (bf16 MXU operands vs f32 reference;
    # differences bounded by one PACT quant step at rounding boundaries).
    ref = _reference_forward(x, params, stride=1, padding=1)
    step = float(params["pact_alpha"]) / 3.0
    max_diff = float(jnp.max(jnp.abs(out.astype(jnp.float32) - ref)))
    assert max_diff <= step + 5e-2, f"max diff too large: {max_diff}"

    print("KERNEL_OK")
</pallas_src>

<mosaic_0001>
module attributes {stable_mosaic.version = 11 : i64} {
  func.func @convblock_kernel(%arg0: i32, %arg1: i32, %arg2: memref<3xf32, #tpu.memory_space<smem>>, %arg3: memref<256x36xbf16, #tpu.memory_space<vmem>>, %arg4: memref<36x8xbf16, #tpu.memory_space<vmem>>, %arg5: memref<1x8xf32, #tpu.memory_space<vmem>>, %arg6: memref<1x8xf32, #tpu.memory_space<vmem>>, %arg7: memref<256x8xf32, #tpu.memory_space<vmem>>) attributes {dimension_semantics = [#tpu.dimension_semantics<parallel>, #tpu.dimension_semantics<parallel>], iteration_bounds = array<i64: 2, 1>, scalar_prefetch = 0 : i64, scratch_operands = 0 : i64, tpu.core_type = #tpu.core_type<tc>, window_params = [{transform_indices = @transform_0, window_bounds = array<i64: 3>}, {transform_indices = @transform_1, window_bounds = array<i64: 256, 36>}, {transform_indices = @transform_2, window_bounds = array<i64: 36, 8>}, {transform_indices = @transform_3, window_bounds = array<i64: 1, 8>}, {transform_indices = @transform_4, window_bounds = array<i64: 1, 8>}, {transform_indices = @transform_5, window_bounds = array<i64: 256, 8>}]} {
    %c0 = arith.constant 0 : index
    %c0_0 = arith.constant 0 : index
    %0 = vector.load %arg3[%c0, %c0_0] : memref<256x36xbf16, #tpu.memory_space<vmem>>, vector<256x36xbf16>
    %c0_1 = arith.constant 0 : index
    %c0_2 = arith.constant 0 : index
    %1 = vector.load %arg4[%c0_1, %c0_2] : memref<36x8xbf16, #tpu.memory_space<vmem>>, vector<36x8xbf16>
    %cst = arith.constant dense<0.000000e+00> : vector<256x8xf32>
    %2 = tpu.matmul %0, %1, %cst {dimension_numbers = #tpu.dot_dimension_numbers<[1], [0], [0], [1], [0, 0, 1, 1], [], []>} : vector<256x36xbf16>, vector<36x8xbf16>, vector<256x8xf32> -> vector<256x8xf32>
    %c0_3 = arith.constant 0 : index
    %c0_4 = arith.constant 0 : index
    %3 = vector.load %arg5[%c0_3, %c0_4] : memref<1x8xf32, #tpu.memory_space<vmem>>, vector<1x8xf32>
    %4 = vector.broadcast %3 : vector<1x8xf32> to vector<256x8xf32>
    %5 = arith.mulf %2, %4 : vector<256x8xf32>
    %c0_5 = arith.constant 0 : index
    %c0_6 = arith.constant 0 : index
    %6 = vector.load %arg6[%c0_5, %c0_6] : memref<1x8xf32, #tpu.memory_space<vmem>>, vector<1x8xf32>
    %7 = vector.broadcast %6 : vector<1x8xf32> to vector<256x8xf32>
    %8 = arith.addf %5, %7 : vector<256x8xf32>
    %c0_7 = arith.constant 0 : index
    %9 = memref.load %arg2[%c0_7] : memref<3xf32, #tpu.memory_space<smem>>
    %c1 = arith.constant 1 : index
    %10 = memref.load %arg2[%c1] : memref<3xf32, #tpu.memory_space<smem>>
    %c2 = arith.constant 2 : index
    %11 = memref.load %arg2[%c2] : memref<3xf32, #tpu.memory_space<smem>>
    %cst_8 = arith.constant 0.000000e+00 : f32
    %12 = vector.broadcast %cst_8 : f32 to vector<256x8xf32>
    %13 = arith.maximumf %12, %8 : vector<256x8xf32>
    %14 = vector.broadcast %9 : f32 to vector<256x8xf32>
    %15 = arith.minimumf %14, %13 : vector<256x8xf32>
    %16 = vector.broadcast %11 : f32 to vector<256x8xf32>
    %17 = arith.mulf %15, %16 : vector<256x8xf32>
    %18 = math.roundeven %17 : vector<256x8xf32>
    %19 = vector.broadcast %10 : f32 to vector<256x8xf32>
    %20 = arith.mulf %18, %19 : vector<256x8xf32>
    %c0_9 = arith.constant 0 : index
    %c0_10 = arith.constant 0 : index
    %21 = vector.load %arg7[%c0_9, %c0_10] : memref<256x8xf32, #tpu.memory_space<vmem>>, vector<256x8xf32>
    tpu.vector_store %arg7[%c0_9, %c0_10], %20 {strides = array<i32>} : memref<256x8xf32, #tpu.memory_space<vmem>>, vector<256x8xf32>,
    return
  }
  func.func @transform_0(%arg0: i32, %arg1: i32) -> i32 {
    %c0_i32 = arith.constant 0 : i32
    %c0_i32_0 = arith.constant 0 : i32
    return %c0_i32 : i32
  }
  func.func @transform_1(%arg0: i32, %arg1: i32) -> (i32, i32) {
    %c0_i32 = arith.constant 0 : i32
    %c0_i32_0 = arith.constant 0 : i32
    return %arg0, %c0_i32 : i32, i32
  }
  func.func @transform_2(%arg0: i32, %arg1: i32) -> (i32, i32) {
    %c0_i32 = arith.constant 0 : i32
    %c0_i32_0 = arith.constant 0 : i32
    return %c0_i32, %arg1 : i32, i32
  }
  func.func @transform_3(%arg0: i32, %arg1: i32) -> (i32, i32) {
    %c0_i32 = arith.constant 0 : i32
    %c0_i32_0 = arith.constant 0 : i32
    return %c0_i32, %arg1 : i32, i32
  }
  func.func @transform_4(%arg0: i32, %arg1: i32) -> (i32, i32) {
    %c0_i32 = arith.constant 0 : i32
    %c0_i32_0 = arith.constant 0 : i32
    return %c0_i32, %arg1 : i32, i32
  }
  func.func @transform_5(%arg0: i32, %arg1: i32) -> (i32, i32) {
    %c0_i32 = arith.constant 0 : i32
    return %arg0, %arg1 : i32, i32
  }
}

</mosaic_0001>

<bundles_post_ra>
// kernel: conv_block_forward.1
= control target key start
LH: loop header
LB: loop body
LE: loop exit
PB: predicated region body
PF: predicated region fallthrough
CT: control target
= control target key end

     0   :  { %10 = vsyncpa [#allocation3], 0  ;;  %s1337_s18 = smov 0   ;;  %s1339_s19 = smov 0   ;;  %s1732_s0 = inlined_call_operand.vmem [shape: f32[3], index: 0, kind: input, shape index: {}]   ;;  %s1733_s1 = inlined_call_operand.vmem [shape: bf16[512,36], index: 1, kind: input, shape index: {}]   ;;  %s1734_s2 = inlined_call_operand.vmem [shape: bf16[36,8], index: 2, kind: input, shape index: {}]   ;;  %s1735_s3 = inlined_call_operand.vmem [shape: f32[1,8], index: 3, kind: input, shape index: {}]   ;;  %s1736_s4 = inlined_call_operand.vmem [shape: f32[1,8], index: 4, kind: input, shape index: {}]   ;;  %s1737_s5 = inlined_call_operand.vmem [shape: f32[512,8], index: 5, kind: output, shape index: {}]  }
   0x1   :  { %s1341_s20 = smov 0  }
   0x2 LB: > { %s1057_s21 = sadd.s32 4294967295, %s1304_s20   ;;  %s28_s22 = sadd.s32 1, %s1300_s19  ;;  %s1304_s20 = sphi %s1341_s20, %s16_s20   ;;  %s1300_s19 = sphi %s1339_s19, %s1741_s19   ;;  %s1296_s18 = sphi %s1337_s18, %s1740_s18  }
   0x3   : > { %p30_p0 = scmp.ge.s32.totalorder %s28_s22, 2  ;;  %p1059_p1 = scmp.ge.s32.totalorder %s1304_s20, 1 }
   0x4   : > { %p186_p2 = scmp.lt.s32.totalorder %s1304_s20, 3  ;;  %p1362_p4 = scmp.eq.s32.totalorder %s1057_s21, 0 }
   0x5   : > { %s1743_s22 = smov (%p30_p0, %s28_s22), 0  ;;  %s199_s27 = sshll.u32 %s1732_s0, 4  ;;  %s200_s27 = int_to_ptr.vmem [resolvable:$true] %s199_s27 }
   0x6   : > { %p1358_p3 = pnand %p1059_p1, %p186_p2  ;;  %s1263_s28 = scalar_lea.vmem %s200_s27, 16 }
   0x7   : > { %p1264_p7 = scmp.ne.s32.totalorder %s200_s27, %s1263_s28  ;;  %p1271_p11 = scmp.lt.s32.totalorder %s200_s27, %s200_s27 }
   0x8   : > { %p1213_p5 = pneg %p1358_p3  ;;  %p1272_p12 = scmp.lt.s32.totalorder %s1263_s28, %s1263_s28 }
   0xa   : > { %p1214_p6 = pnand %p1362_p4, %p1213_p5  ;;  %p1273_p13 = por %p1272_p12, %p1271_p11 }
   0xc   : > { %p1265_p8 = pneg %p1214_p6 }
   0xe   : > { %p1266_p9 = pnand %p1265_p8, %p1264_p7 }
  0x10   : > { %p1267_p10 = pneg %p1266_p9 }
  0x12   : > { %p1274_p0 = pnand %p1273_p13, %p1267_p10 }
  0x14   : > { %1277 = shalt.err (!%p1274_p0)
}
  0x15   : > { %s1306_s29 = smov [#allocation2]   ;;  %240 = sbr.rel (%p1358_p3) target bundleno = 319 (0x13f), region = 40 }
  0x16   : > { %1216 = dma.vmem_to_smem (!%p1214_p6), %s200_s27, 16, %s1306_s29, [#allocation3]  }
  0x1c   : > { %1291 = dma.done.wait (%p1362_p4), [#allocation3], 16  }
  0x1d   : > { %1293 = vsyncadd (%p1362_p4), [#allocation3], 4294967280 }
  0x1e   : > { %246 = sfence }
  0x1f   : > { %v1244_v0 = vld [vmem:[%s1734_s2] sm:$0xff]   ;;  %v1245_v1 = vld [vmem:[%s1734_s2 + $0x8] sm:$0xff]   ;;  %s1067_s9 = sshll.u32 %s1296_s18, 5  ;;  %v1246_v2 = vld [vmem:[%s1734_s2 + $0x10] ss:$0 sps:$4 sm:$0x33]  }
  0x20   : > { %1131 = vmatprep.subr.bf16.mxu0 %v1244_v0  ;;  %1169 = vmatprep.subr.bf16.mxu1 %v1244_v0  ;;  %p283_p1 = scmp.lt.s32.totalorder %s1067_s9, 63  ;;  %vm489_vm0 = vcmask 1041408   ;;  %vm440_vm1 = vcmask 293888   ;;  %s732_s16 = sld [smem:[#allocation2]]  ;;  %v1432_v20 = vld [vmem:[%s1735_s3] ss:$0 sm:$0xff] }
  0x21   : > { %1132 = vmatpush3.bf16.msra.mxu0 %v1244_v0  ;;  %1172 = vmatpush3.bf16.msra.mxu1 %v1244_v0  ;;  %v491_v3 = vsel %vm489_vm0, %v1246_v2, 0  ;;  %s1108_s17 = sld [smem:[#allocation2 + $0x1]]  ;;  %s1109_s18 = sld [smem:[#allocation2 + $0x2]]  ;;  %v1437_v22 = vld [vmem:[%s1736_s4] ss:$0 sm:$0xff]  ;;  %vm898_vm2 = vcmask 64512  }
  0x22   : > { %1133 = vmatprep.subr.bf16.mxu0 %v1245_v1  ;;  %1170 = vmatprep.subr.bf16.mxu1 %v1245_v1  ;;  %s1745_s9 = smov (!%p283_p1, %s1067_s9), 63 }
  0x23   : > { %s1068_s12 = sshll.u32 %s1745_s9, 2  ;;  %s1070_s26 = sshll.u32 %s1745_s9, 3 }
  0x24   : > { %s1395_s15 = scalar_lea.vmem %s1733_s1, %s1068_s12  ;;  %s1479_s29 = scalar_lea.vmem %s1737_s5, %s1070_s26 }
  0x25   : > { %1134 = vmatpush3.bf16.msra.mxu0 %v1245_v1  ;;  %1173 = vmatpush3.bf16.msra.mxu1 %v1245_v1  ;;  %v1247_v4 = vld [vmem:[%s1395_s15] sm:$0xff]   ;;  %v1249_v6 = vld [vmem:[%s1395_s15 + $0x8] sm:$0xff]   ;;  %v1251_v8 = vld [vmem:[%s1395_s15 + $0x10] sm:$0xff]  }
  0x26   : > { %1175 = vmatprep.subr.msk.bf16.mxu0 %vm489_vm0, %v1246_v2  ;;  %1176 = vmatprep.subr.msk.bf16.mxu1 %vm489_vm0, %v1246_v2  ;;  %v1248_v5 = vld [vmem:[%s1395_s15 + $0x40] sm:$0xff]   ;;  %v1250_v7 = vld [vmem:[%s1395_s15 + $0x48] sm:$0xff]   ;;  %v1252_v9 = vld [vmem:[%s1395_s15 + $0x50] sm:$0xff]   ;;  %v1440_v25 = vstv %s732_s16 }
  0x27   : > { %1137 = vmatprep.mubr.msk.bf16.mxu0 %vm440_vm1, %v1247_v4  ;;  %1153 = vmatprep.mubr.msk.bf16.mxu1 %vm440_vm1, %v1248_v5  ;;  %v1253_v10 = vld [vmem:[%s1395_s15 + $0x18] sm:$0xff]   ;;  %v1255_v12 = vld [vmem:[%s1395_s15 + $0x20] sm:$0xff]   ;;  %v1257_v14 = vld [vmem:[%s1395_s15 + $0x28] sm:$0xff]   ;;  %v1443_v29 = vstv %s1109_s18 }
  0x28   : > { %v1254_v11 = vld [vmem:[%s1395_s15 + $0x58] sm:$0xff]   ;;  %v1256_v13 = vld [vmem:[%s1395_s15 + $0x60] sm:$0xff]   ;;  %v1258_v15 = vld [vmem:[%s1395_s15 + $0x68] sm:$0xff]   ;;  %v1445_v30 = vstv %s1108_s17 }
  0x29   : > { %1136 = vmatpush3.bf16.msra.mxu0 %v491_v3  ;;  %1174 = vmatpush3.bf16.msra.mxu1 %v491_v3  ;;  %v1259_v16 = vld [vmem:[%s1395_s15 + $0x30] sm:$0xff]   ;;  %v1261_v18 = vld [vmem:[%s1395_s15 + $0x38] sm:$0xff]  }
  0x2a   : > { %v1260_v17 = vld [vmem:[%s1395_s15 + $0x70] sm:$0xff]   ;;  %v1262_v19 = vld [vmem:[%s1395_s15 + $0x78] sm:$0xff]  }
  0x2c   : > { %1138 = vmatmul.mubr.msk.bf16.vlgmr.msra.gmra.mrb[0].mxu0 %vm440_vm1, %v1249_v6  ;;  %1154 = vmatmul.mubr.msk.bf16.vlgmr.msra.gmra.mrb[0].mxu1 %vm440_vm1, %v1250_v7 }
  0x2d   : > { %1141 = vmatprep.mubr.msk.bf16.mxu0 %vm440_vm1, %v1251_v8  ;;  %1157 = vmatprep.mubr.msk.bf16.mxu1 %vm440_vm1, %v1252_v9 }
  0x34   : > { %1142 = vmatmul.mubr.msk.bf16.gmra.mrb[4].mxu0 %vm440_vm1, %v1253_v10  ;;  %1158 = vmatmul.mubr.msk.bf16.gmra.mrb[4].mxu1 %vm440_vm1, %v1254_v11 }
  0x35   : > { %1145 = vmatprep.mubr.msk.bf16.mxu0 %vm440_vm1, %v1255_v12  ;;  %1161 = vmatprep.mubr.msk.bf16.mxu1 %vm440_vm1, %v1256_v13 }
  0x3c   : > { %1146 = vmatmul.mubr.msk.bf16.gmra.mrb[8].mxu0 %vm440_vm1, %v1257_v14  ;;  %1162 = vmatmul.mubr.msk.bf16.gmra.mrb[8].mxu1 %vm440_vm1, %v1258_v15 }
  0x3d   : > { %1149 = vmatprep.mubr.msk.bf16.mxu0 %vm440_vm1, %v1259_v16  ;;  %1165 = vmatprep.mubr.msk.bf16.mxu1 %vm440_vm1, %v1260_v17 }
  0x44   : > { %1150 = vmatmul.mubr.msk.bf16.gmra.mrb[12].mxu0 %vm440_vm1, %v1261_v18  ;;  %1166 = vmatmul.mubr.msk.bf16.gmra.mrb[12].mxu1 %vm440_vm1, %v1262_v19 }
  0xff   : > { %v1139_v21 = vpop.f32.mrb[0].mxu0  ;;  %v1155_v23 = vpop.f32.mrb[0].mxu1 }
 0x100   : > { %v663_v24 = vmul.f32 %v1139_v21, %v1432_v20  ;;  %v679_v26 = vmul.f32 %v1155_v23, %v1432_v20  ;;  %v527_v27 = vpop.f32.mrb[1].mxu0  ;;  %v591_v28 = vpop.f32.mrb[1].mxu1 }
 0x101   : > { %v661_v31 = vmul.f32 %v1432_v20, %v527_v27  ;;  %v677_v32 = vmul.f32 %v1432_v20, %v591_v28  ;;  %v1140_v33 = vpop.f32.mrb[2].mxu0  ;;  %v1156_v34 = vpop.f32.mrb[2].mxu1 }
 0x102   : > { %v702_v35 = vadd.f32 %v1437_v22, %v663_v24  ;;  %v718_v36 = vadd.f32 %v1437_v22, %v679_v26  ;;  %v664_v37 = vmul.f32 %v1140_v33, %v1432_v20  ;;  %v680_v38 = vmul.f32 %v1156_v34, %v1432_v20  ;;  %v530_v39 = vpop.f32.mrb[3].mxu0  ;;  %v594_v40 = vpop.f32.mrb[3].mxu1 }
 0x103   : > { %v700_v41 = vadd.f32 %v1437_v22, %v661_v31  ;;  %v716_v42 = vadd.f32 %v1437_v22, %v677_v32  ;;  %v662_v43 = vmul.f32 %v1432_v20, %v530_v39  ;;  %v678_v44 = vmul.f32 %v1432_v20, %v594_v40 }
 0x104   : > { %v737_v45 = vmax.f32 %v702_v35, 0.0  ;;  %v753_v46 = vmax.f32 %v718_v36, 0.0  ;;  %v703_v47 = vadd.f32 %v1437_v22, %v664_v37  ;;  %v719_v48 = vadd.f32 %v1437_v22, %v680_v38 }
 0x105   : > { %v735_v49 = vmax.f32 %v700_v41, 0.0  ;;  %v751_v50 = vmax.f32 %v716_v42, 0.0  ;;  %v701_v51 = vadd.f32 %v1437_v22, %v662_v43  ;;  %v717_v52 = vadd.f32 %v1437_v22, %v678_v44 }
 0x106   : > { %v770_v53 = vmin.f32 %v1440_v25, %v737_v45  ;;  %v786_v54 = vmin.f32 %v1440_v25, %v753_v46  ;;  %v738_v55 = vmax.f32 %v703_v47, 0.0  ;;  %v754_v56 = vmax.f32 %v719_v48, 0.0 }
 0x107   : > { %v768_v57 = vmin.f32 %v1440_v25, %v735_v49  ;;  %v784_v58 = vmin.f32 %v1440_v25, %v751_v50  ;;  %v736_v59 = vmax.f32 %v701_v51, 0.0  ;;  %v752_v60 = vmax.f32 %v717_v52, 0.0  ;;  %v1143_v61 = vpop.f32.mrb[4].mxu0  ;;  %v1159_v62 = vpop.f32.mrb[4].mxu1 }
 0x108   : > { %v803_v63 = vmul.f32 %v1443_v29, %v770_v53  ;;  %v819_v0 = vmul.f32 %v1443_v29, %v786_v54  ;;  %v771_v1 = vmin.f32 %v1440_v25, %v738_v55  ;;  %v787_v2 = vmin.f32 %v1440_v25, %v754_v56  ;;  %v543_v3 = vpop.f32.mrb[5].mxu0  ;;  %v607_v4 = vpop.f32.mrb[5].mxu1 }
 0x109   : > { %v801_v5 = vmul.f32 %v1443_v29, %v768_v57  ;;  %v817_v6 = vmul.f32 %v1443_v29, %v784_v58  ;;  %v769_v7 = vmin.f32 %v1440_v25, %v736_v59  ;;  %v785_v8 = vmin.f32 %v1440_v25, %v752_v60  ;;  %v1144_v9 = vpop.f32.mrb[6].mxu0  ;;  %v1160_v10 = vpop.f32.mrb[6].mxu1 }
 0x10a   : > { %v1179_v11 = vround.rtne.f32 %v803_v63  ;;  %v1195_v12 = vround.rtne.f32 %v819_v0  ;;  %v804_v13 = vmul.f32 %v1443_v29, %v771_v1  ;;  %v820_v14 = vmul.f32 %v1443_v29, %v787_v2  ;;  %v546_v15 = vpop.f32.mrb[7].mxu0  ;;  %v610_v16 = vpop.f32.mrb[7].mxu1 }
 0x10b   : > { %v1177_v17 = vround.rtne.f32 %v801_v5  ;;  %v1193_v18 = vround.rtne.f32 %v817_v6  ;;  %v802_v19 = vmul.f32 %v1443_v29, %v769_v7  ;;  %v818_v21 = vmul.f32 %v1443_v29, %v785_v8 }
 0x10c   : > { %v868_v23 = vmul.f32 %v1179_v11, %v1445_v30  ;;  %v884_v24 = vmul.f32 %v1195_v12, %v1445_v30  ;;  %v1180_v26 = vround.rtne.f32 %v804_v13  ;;  %v1196_v27 = vround.rtne.f32 %v820_v14 }
 0x10d   : > { %v866_v28 = vmul.f32 %v1177_v17, %v1445_v30  ;;  %v882_v31 = vmul.f32 %v1193_v18, %v1445_v30  ;;  %v1178_v32 = vround.rtne.f32 %v802_v19  ;;  %v1194_v33 = vround.rtne.f32 %v818_v21 }
 0x10e   : > { %901 = vst.msk [vmem:[%s1479_s29 + $0x10] sm:$0xff] %vm898_vm2, %v868_v23  ;;  %917 = vst.msk [vmem:[%s1479_s29 + $0x90] sm:$0xff] %vm898_vm2, %v884_v24  ;;  %v869_v34 = vmul.f32 %v1180_v26, %v1445_v30  ;;  %v885_v35 = vmul.f32 %v1196_v27, %v1445_v30  ;;  %v667_v36 = vmul.f32 %v1143_v61, %v1432_v20 }
 0x10f   : > { %v683_v37 = vmul.f32 %v1159_v62, %v1432_v20  ;;  %899 = vst.msk [vmem:[%s1479_s29] sm:$0xff] %vm898_vm2, %v866_v28  ;;  %915 = vst.msk [vmem:[%s1479_s29 + $0x80] sm:$0xff] %vm898_vm2, %v882_v31  ;;  %v867_v38 = vmul.f32 %v1178_v32, %v1445_v30  ;;  %v883_v39 = vmul.f32 %v1194_v33, %v1445_v30  ;;  %v1503_v42 = vpop.f32.mrb[8].mxu0  ;;  %v1505_v43 = vpop.f32.mrb[8].mxu1 }
 0x110   : > { %v665_v40 = vmul.f32 %v1432_v20, %v543_v3  ;;  %v681_v41 = vmul.f32 %v1432_v20, %v607_v4  ;;  %902 = vst.msk [vmem:[%s1479_s29 + $0x18] sm:$0xff] %vm898_vm2, %v869_v34  ;;  %918 = vst.msk [vmem:[%s1479_s29 + $0x98] sm:$0xff] %vm898_vm2, %v885_v35  ;;  %v706_v44 = vadd.f32 %v1437_v22, %v667_v36  ;;  %v1515_v48 = vpop.f32.mrb[9].mxu0  ;;  %v1517_v49 = vpop.f32.mrb[9].mxu1 }
 0x111   : > { %v722_v45 = vadd.f32 %v1437_v22, %v683_v37  ;;  %v668_v46 = vmul.f32 %v1144_v9, %v1432_v20  ;;  %v684_v47 = vmul.f32 %v1160_v10, %v1432_v20  ;;  %900 = vst.msk [vmem:[%s1479_s29 + $0x8] sm:$0xff] %vm898_vm2, %v867_v38  ;;  %916 = vst.msk [vmem:[%s1479_s29 + $0x88] sm:$0xff] %vm898_vm2, %v883_v39  ;;  %v1527_v54 = vpop.f32.mrb[10].mxu0  ;;  %v1529_v55 = vpop.f32.mrb[10].mxu1 }
 0x112   : > { %v704_v50 = vadd.f32 %v1437_v22, %v665_v40  ;;  %v720_v51 = vadd.f32 %v1437_v22, %v681_v41  ;;  %v666_v52 = vmul.f32 %v1432_v20, %v546_v15  ;;  %v682_v53 = vmul.f32 %v1432_v20, %v610_v16  ;;  %v1533_v60 = vpop.f32.mrb[11].mxu0  ;;  %v1535_v61 = vpop.f32.mrb[11].mxu1 }
 0x113   : > { %v741_v56 = vmax.f32 %v706_v44, 0.0  ;;  %v757_v57 = vmax.f32 %v722_v45, 0.0  ;;  %v707_v58 = vadd.f32 %v1437_v22, %v668_v46  ;;  %v723_v59 = vadd.f32 %v1437_v22, %v684_v47 }
 0x114   : > { %v739_v62 = vmax.f32 %v704_v50, 0.0  ;;  %v755_v63 = vmax.f32 %v720_v51, 0.0  ;;  %v705_v0 = vadd.f32 %v1437_v22, %v666_v52  ;;  %v721_v1 = vadd.f32 %v1437_v22, %v682_v53 }
 0x115   : > { %v774_v2 = vmin.f32 %v1440_v25, %v741_v56  ;;  %v790_v3 = vmin.f32 %v1440_v25, %v757_v57  ;;  %v742_v4 = vmax.f32 %v707_v58, 0.0  ;;  %v758_v5 = vmax.f32 %v723_v59, 0.0 }
 0x116   : > { %v772_v6 = vmin.f32 %v1440_v25, %v739_v62  ;;  %v788_v7 = vmin.f32 %v1440_v25, %v755_v63  ;;  %v740_v8 = vmax.f32 %v705_v0, 0.0  ;;  %v756_v9 = vmax.f32 %v721_v1, 0.0 }
 0x117   : > { %v807_v10 = vmul.f32 %v1443_v29, %v774_v2  ;;  %v823_v11 = vmul.f32 %v1443_v29, %v790_v3  ;;  %v775_v12 = vmin.f32 %v1440_v25, %v742_v4  ;;  %v791_v13 = vmin.f32 %v1440_v25, %v758_v5  ;;  %v1551_v18 = vpop.f32.mrb[12].mxu0  ;;  %v1553_v19 = vpop.f32.mrb[12].mxu1 }
 0x118   : > { %v805_v14 = vmul.f32 %v1443_v29, %v772_v6  ;;  %v821_v15 = vmul.f32 %v1443_v29, %v788_v7  ;;  %v773_v16 = vmin.f32 %v1440_v25, %v740_v8  ;;  %v789_v17 = vmin.f32 %v1440_v25, %v756_v9  ;;  %v1557_v27 = vpop.f32.mrb[13].mxu0  ;;  %v1559_v28 = vpop.f32.mrb[13].mxu1 }
 0x119   : > { %v1183_v21 = vround.rtne.f32 %v807_v10  ;;  %v1199_v23 = vround.rtne.f32 %v823_v11  ;;  %v808_v24 = vmul.f32 %v1443_v29, %v775_v12  ;;  %v824_v26 = vmul.f32 %v1443_v29, %v791_v13  ;;  %v1563_v35 = vpop.f32.mrb[14].mxu0  ;;  %v1565_v36 = vpop.f32.mrb[14].mxu1 }
 0x11a   : > { %v1181_v31 = vround.rtne.f32 %v805_v14  ;;  %v1197_v32 = vround.rtne.f32 %v821_v15  ;;  %v806_v33 = vmul.f32 %v1443_v29, %v773_v16  ;;  %v822_v34 = vmul.f32 %v1443_v29, %v789_v17  ;;  %v1569_v41 = vpop.f32.mrb[15].mxu0  ;;  %v1571_v44 = vpop.f32.mrb[15].mxu1 }
 0x11b   : > { %v872_v37 = vmul.f32 %v1183_v21, %v1445_v30  ;;  %v888_v38 = vmul.f32 %v1199_v23, %v1445_v30  ;;  %v1184_v39 = vround.rtne.f32 %v808_v24  ;;  %v1200_v40 = vround.rtne.f32 %v824_v26 }
 0x11c   : > { %v870_v45 = vmul.f32 %v1181_v31, %v1445_v30  ;;  %v886_v46 = vmul.f32 %v1197_v32, %v1445_v30  ;;  %v1182_v47 = vround.rtne.f32 %v806_v33  ;;  %v1198_v50 = vround.rtne.f32 %v822_v34 }
 0x11d   : > { %905 = vst.msk [vmem:[%s1479_s29 + $0x30] sm:$0xff] %vm898_vm2, %v872_v37  ;;  %921 = vst.msk [vmem:[%s1479_s29 + $0xb0] sm:$0xff] %vm898_vm2, %v888_v38  ;;  %v873_v51 = vmul.f32 %v1184_v39, %v1445_v30  ;;  %v889_v52 = vmul.f32 %v1200_v40, %v1445_v30  ;;  %v671_v53 = vmul.f32 %v1503_v42, %v1432_v20 }
 0x11e   : > { %v687_v56 = vmul.f32 %v1505_v43, %v1432_v20  ;;  %903 = vst.msk [vmem:[%s1479_s29 + $0x20] sm:$0xff] %vm898_vm2, %v870_v45  ;;  %919 = vst.msk [vmem:[%s1479_s29 + $0xa0] sm:$0xff] %vm898_vm2, %v886_v46  ;;  %v871_v57 = vmul.f32 %v1182_v47, %v1445_v30  ;;  %v887_v58 = vmul.f32 %v1198_v50, %v1445_v30 }
 0x11f   : > { %v669_v59 = vmul.f32 %v1432_v20, %v1515_v48  ;;  %v685_v62 = vmul.f32 %v1432_v20, %v1517_v49  ;;  %906 = vst.msk [vmem:[%s1479_s29 + $0x38] sm:$0xff] %vm898_vm2, %v873_v51  ;;  %922 = vst.msk [vmem:[%s1479_s29 + $0xb8] sm:$0xff] %vm898_vm2, %v889_v52  ;;  %v710_v42 = vadd.f32 %v1437_v22, %v671_v53 }
 0x120   : > { %v726_v43 = vadd.f32 %v1437_v22, %v687_v56  ;;  %v672_v63 = vmul.f32 %v1527_v54, %v1432_v20  ;;  %v688_v0 = vmul.f32 %v1529_v55, %v1432_v20  ;;  %904 = vst.msk [vmem:[%s1479_s29 + $0x28] sm:$0xff] %vm898_vm2, %v871_v57  ;;  %920 = vst.msk [vmem:[%s1479_s29 + $0xa8] sm:$0xff] %vm898_vm2, %v887_v58 }
 0x121   : > { %v708_v48 = vadd.f32 %v1437_v22, %v669_v59  ;;  %v724_v49 = vadd.f32 %v1437_v22, %v685_v62  ;;  %v670_v1 = vmul.f32 %v1432_v20, %v1533_v60  ;;  %v686_v2 = vmul.f32 %v1432_v20, %v1535_v61 }
 0x122   : > { %v745_v3 = vmax.f32 %v710_v42, 0.0  ;;  %v761_v4 = vmax.f32 %v726_v43, 0.0  ;;  %v711_v54 = vadd.f32 %v1437_v22, %v672_v63  ;;  %v727_v55 = vadd.f32 %v1437_v22, %v688_v0 }
 0x123   : > { %v743_v5 = vmax.f32 %v708_v48, 0.0  ;;  %v759_v6 = vmax.f32 %v724_v49, 0.0  ;;  %v709_v7 = vadd.f32 %v1437_v22, %v670_v1  ;;  %v725_v8 = vadd.f32 %v1437_v22, %v686_v2 }
 0x124   : > { %v778_v9 = vmin.f32 %v1440_v25, %v745_v3  ;;  %v794_v10 = vmin.f32 %v1440_v25, %v761_v4  ;;  %v746_v60 = vmax.f32 %v711_v54, 0.0  ;;  %v762_v11 = vmax.f32 %v727_v55, 0.0 }
 0x125   : > { %v776_v61 = vmin.f32 %v1440_v25, %v743_v5  ;;  %v792_v12 = vmin.f32 %v1440_v25, %v759_v6  ;;  %v744_v13 = vmax.f32 %v709_v7, 0.0  ;;  %v760_v14 = vmax.f32 %v725_v8, 0.0 }
 0x126   : > { %v811_v15 = vmul.f32 %v1443_v29, %v778_v9  ;;  %v827_v16 = vmul.f32 %v1443_v29, %v794_v10  ;;  %v779_v17 = vmin.f32 %v1440_v25, %v746_v60  ;;  %v795_v21 = vmin.f32 %v1440_v25, %v762_v11 }
 0x127   : > { %v809_v23 = vmul.f32 %v1443_v29, %v776_v61  ;;  %v825_v24 = vmul.f32 %v1443_v29, %v792_v12  ;;  %v777_v26 = vmin.f32 %v1440_v25, %v744_v13  ;;  %v793_v31 = vmin.f32 %v1440_v25, %v760_v14 }
 0x128   : > { %v1187_v32 = vround.rtne.f32 %v811_v15  ;;  %v1203_v33 = vround.rtne.f32 %v827_v16  ;;  %v812_v34 = vmul.f32 %v1443_v29, %v779_v17  ;;  %v828_v37 = vmul.f32 %v1443_v29, %v795_v21 }
 0x129   : > { %v1185_v38 = vround.rtne.f32 %v809_v23  ;;  %v1201_v39 = vround.rtne.f32 %v825_v24  ;;  %v810_v40 = vmul.f32 %v1443_v29, %v777_v26  ;;  %v826_v45 = vmul.f32 %v1443_v29, %v793_v31 }
 0x12a   : > { %v876_v46 = vmul.f32 %v1187_v32, %v1445_v30  ;;  %v892_v47 = vmul.f32 %v1203_v33, %v1445_v30  ;;  %v1188_v50 = vround.rtne.f32 %v812_v34  ;;  %v1204_v51 = vround.rtne.f32 %v828_v37 }
 0x12b   : > { %v874_v52 = vmul.f32 %v1185_v38, %v1445_v30  ;;  %v890_v53 = vmul.f32 %v1201_v39, %v1445_v30  ;;  %v1186_v56 = vround.rtne.f32 %v810_v40  ;;  %v1202_v57 = vround.rtne.f32 %v826_v45 }
 0x12c   : > { %909 = vst.msk [vmem:[%s1479_s29 + $0x50] sm:$0xff] %vm898_vm2, %v876_v46  ;;  %925 = vst.msk [vmem:[%s1479_s29 + $0xd0] sm:$0xff] %vm898_vm2, %v892_v47  ;;  %v877_v58 = vmul.f32 %v1188_v50, %v1445_v30  ;;  %v893_v59 = vmul.f32 %v1204_v51, %v1445_v30  ;;  %v675_v62 = vmul.f32 %v1551_v18, %v1432_v20 }
 0x12d   : > { %v691_v42 = vmul.f32 %v1553_v19, %v1432_v20  ;;  %907 = vst.msk [vmem:[%s1479_s29 + $0x40] sm:$0xff] %vm898_vm2, %v874_v52  ;;  %923 = vst.msk [vmem:[%s1479_s29 + $0xc0] sm:$0xff] %vm898_vm2, %v890_v53  ;;  %v875_v43 = vmul.f32 %v1186_v56, %v1445_v30  ;;  %v891_v63 = vmul.f32 %v1202_v57, %v1445_v30 }
 0x12e   : > { %v673_v0 = vmul.f32 %v1432_v20, %v1557_v27  ;;  %v689_v48 = vmul.f32 %v1432_v20, %v1559_v28  ;;  %910 = vst.msk [vmem:[%s1479_s29 + $0x58] sm:$0xff] %vm898_vm2, %v877_v58  ;;  %926 = vst.msk [vmem:[%s1479_s29 + $0xd8] sm:$0xff] %vm898_vm2, %v893_v59  ;;  %v714_v18 = vadd.f32 %v1437_v22, %v675_v62 }
 0x12f   : > { %v730_v19 = vadd.f32 %v1437_v22, %v691_v42  ;;  %v676_v49 = vmul.f32 %v1563_v35, %v1432_v20  ;;  %v692_v1 = vmul.f32 %v1565_v36, %v1432_v20  ;;  %908 = vst.msk [vmem:[%s1479_s29 + $0x48] sm:$0xff] %vm898_vm2, %v875_v43  ;;  %924 = vst.msk [vmem:[%s1479_s29 + $0xc8] sm:$0xff] %vm898_vm2, %v891_v63 }
 0x130   : > { %v712_v27 = vadd.f32 %v1437_v22, %v673_v0  ;;  %v728_v28 = vadd.f32 %v1437_v22, %v689_v48  ;;  %v674_v2 = vmul.f32 %v1432_v20, %v1569_v41  ;;  %v690_v3 = vmul.f32 %v1432_v20, %v1571_v44 }
 0x131   : > { %v749_v4 = vmax.f32 %v714_v18, 0.0  ;;  %v765_v54 = vmax.f32 %v730_v19, 0.0  ;;  %v715_v35 = vadd.f32 %v1437_v22, %v676_v49  ;;  %v731_v36 = vadd.f32 %v1437_v22, %v692_v1 }
 0x132   : > { %v747_v55 = vmax.f32 %v712_v27, 0.0  ;;  %v763_v5 = vmax.f32 %v728_v28, 0.0  ;;  %v713_v6 = vadd.f32 %v1437_v22, %v674_v2  ;;  %v729_v7 = vadd.f32 %v1437_v22, %v690_v3 }
 0x133   : > { %v782_v8 = vmin.f32 %v1440_v25, %v749_v4  ;;  %v798_v9 = vmin.f32 %v1440_v25, %v765_v54  ;;  %v750_v41 = vmax.f32 %v715_v35, 0.0  ;;  %v766_v10 = vmax.f32 %v731_v36, 0.0 }
 0x134   : > { %v780_v20 = vmin.f32 %v1440_v25, %v747_v55  ;;  %v796_v44 = vmin.f32 %v1440_v25, %v763_v5  ;;  %v748_v60 = vmax.f32 %v713_v6, 0.0  ;;  %v764_v11 = vmax.f32 %v729_v7, 0.0 }
 0x135   : > { %v815_v61 = vmul.f32 %v1443_v29, %v782_v8  ;;  %v831_v12 = vmul.f32 %v1443_v29, %v798_v9  ;;  %v783_v13 = vmin.f32 %v1440_v25, %v750_v41  ;;  %v799_v22 = vmin.f32 %v1440_v25, %v766_v10 }
 0x136   : > { %v813_v14 = vmul.f32 %v1443_v29, %v780_v20  ;;  %v829_v15 = vmul.f32 %v1443_v29, %v796_v44  ;;  %v781_v16 = vmin.f32 %v1440_v25, %v748_v60  ;;  %v797_v17 = vmin.f32 %v1440_v25, %v764_v11 }
 0x137   : > { %v1191_v21 = vround.rtne.f32 %v815_v61  ;;  %v1207_v23 = vround.rtne.f32 %v831_v12  ;;  %v816_v24 = vmul.f32 %v1443_v29, %v783_v13  ;;  %v832_v26 = vmul.f32 %v1443_v29, %v799_v22 }
 0x138   : > { %v1189_v31 = vround.rtne.f32 %v813_v14  ;;  %v1205_v32 = vround.rtne.f32 %v829_v15  ;;  %v814_v33 = vmul.f32 %v1443_v29, %v781_v16  ;;  %v830_v34 = vmul.f32 %v1443_v29, %v797_v17 }
 0x139   : > { %v880_v37 = vmul.f32 %v1191_v21, %v1445_v30  ;;  %v896_v25 = vmul.f32 %v1207_v23, %v1445_v30  ;;  %v1192_v38 = vround.rtne.f32 %v816_v24  ;;  %v1208_v39 = vround.rtne.f32 %v832_v26 }
 0x13a   : > { %v878_v40 = vmul.f32 %v1189_v31, %v1445_v30  ;;  %v894_v45 = vmul.f32 %v1205_v32, %v1445_v30  ;;  %v1190_v46 = vround.rtne.f32 %v814_v33  ;;  %v1206_v47 = vround.rtne.f32 %v830_v34 }
 0x13b   : > { %913 = vst.msk [vmem:[%s1479_s29 + $0x70] sm:$0xff] %vm898_vm2, %v880_v37  ;;  %929 = vst.msk [vmem:[%s1479_s29 + $0xf0] sm:$0xff] %vm898_vm2, %v896_v25  ;;  %v881_v29 = vmul.f32 %v1192_v38, %v1445_v30  ;;  %v897_v50 = vmul.f32 %v1208_v39, %v1445_v30 }
 0x13c   : > { %911 = vst.msk [vmem:[%s1479_s29 + $0x60] sm:$0xff] %vm898_vm2, %v878_v40  ;;  %927 = vst.msk [vmem:[%s1479_s29 + $0xe0] sm:$0xff] %vm898_vm2, %v894_v45  ;;  %v879_v51 = vmul.f32 %v1190_v46, %v1445_v30  ;;  %v895_v52 = vmul.f32 %v1206_v47, %v1445_v30 }
 0x13d   : > { %914 = vst.msk [vmem:[%s1479_s29 + $0x78] sm:$0xff] %vm898_vm2, %v881_v29  ;;  %930 = vst.msk [vmem:[%s1479_s29 + $0xf8] sm:$0xff] %vm898_vm2, %v897_v50 }
 0x13e   : > { %912 = vst.msk [vmem:[%s1479_s29 + $0x68] sm:$0xff] %vm898_vm2, %v879_v51  ;;  %928 = vst.msk [vmem:[%s1479_s29 + $0xe8] sm:$0xff] %vm898_vm2, %v895_v52 }
 0x13f PF: > { %s16_s20 = sadd.s32 1, %s1304_s20   ;;  %s1740_s18 = smov %s1300_s19 }
 0x140   : > { %p13_p2 = scmp.ge.s32.totalorder %s16_s20, 4   ;;  %s1741_s19 = smov %s1743_s22 }
 0x142   :  { %15 = sbr.rel (!%p13_p2) target bundleno = 2 (0x2), region = 84 }
 0x149   :  { %959 = vsyncpa [#allocation3], 1 }
 0x14a   :  { %961 = vsyncpa [#allocation3 + $0x1], 1 }

</bundles_post_ra>
